<compile_context>
chip_gen: v6e
topology: v6e:2x2x1
jax: 0.10.0
libtpu: 0.0.40
codegen_flags: <defaults>
</compile_context>

<pallas_src>
import functools

import jax
import jax.numpy as jnp
from jax.experimental import pallas as pl
from jax.experimental.pallas import tpu as pltpu

INPUT_SIZE = 5   # forced by x_t.view(-1, 5)
HIDDEN_SIZE = 2  # forced by h_t.view(-1, 2)
EPSILON = 0.2


def _eg_lstm_seq_kernel(x2_ref, rm_ref, wb_ref, h0_ref, c0_ref,
                        h_out_ref, c_out_ref,
                        *, seq_len, batch, hidden_size, input_size):
    """Whole T-step epsilon-greedy LSTM recurrence in one kernel invocation."""
    T, B, H, IN = seq_len, batch, hidden_size, input_size

    wb = wb_ref[...]                               # (H+IN+1, 4H), VMEM-resident
    w_h = wb[0:H, :]                               # rows for the h features
    w_x = wb[H:H + IN, :]                          # rows for the x features
    bias = wb[H + IN:H + IN + 1, :]                # (1, 4H)

    # Non-recurrent x-projection for ALL timesteps in one MXU pass
    # (hoisted out of the sequential recurrence).
    zx_all = jnp.dot(x2_ref[...], w_x,
                     preferred_element_type=jnp.float32) + bias   # (T*B, 4H)

    rm = rm_ref[...]                               # (T, B, 8H) = [rand4 | mask4]

    # Lane mask for the single full-width activation blend (hoisted out of loop).
    lane = jax.lax.broadcasted_iota(jnp.int32, (B, 4 * H), 1)
    is_tanh_lane = lane >= 3 * H                   # c_hat lanes use tanh, rest sigmoid

    h = h0_ref[...]                                # (B, H) carried in vregs
    c = c0_ref[...]

    # T is static and tiny: fully unrolled, every slice is static.
    for t in range(T):
        z = (zx_all[t * B:(t + 1) * B, :]
             + jnp.dot(h, w_h, preferred_element_type=jnp.float32))   # (B, 4H)

        # One full-width activation pass + single lane blend (no per-gate slices).
        gates = jnp.where(is_tanh_lane, jnp.tanh(z), jax.nn.sigmoid(z))

        # Epsilon-greedy replacement for f/i/o as ONE full-width select
        # (mask is identically 0 on the c_hat lanes, so c_hat is never replaced).
        rand4 = rm[t, :, 0:4 * H]
        mask4 = rm[t, :, 4 * H:8 * H]
        gates = jnp.where(mask4 > 0.0, rand4, gates)

        f_t   = gates[:, 0 * H:1 * H]
        i_t   = gates[:, 1 * H:2 * H]
        o_t   = gates[:, 2 * H:3 * H]
        c_hat = gates[:, 3 * H:4 * H]

        c = f_t * c + i_t * c_hat
        h = o_t * jnp.tanh(c)

        h_out_ref[t, :, :] = h
        c_out_ref[t, :, :] = c


def pack_params(params):
    """Pack the four nn.Linear layers once: rows [W_h(2) ; W_x(5) ; bias(1)] x 4H cols."""
    w_f, b_f, w_i, b_i, w_o, b_o, w_c, b_c = params
    w_all = jnp.concatenate([w_f.T, w_i.T, w_o.T, w_c.T], axis=1)        # (7, 4H)
    b_all = jnp.concatenate([b_f, b_i, b_o, b_c])[None, :]               # (1, 4H)
    return jnp.concatenate([w_all, b_all], axis=0).astype(jnp.float32)   # (8, 4H)


def epsilon_greedy_lstm_sequence(xs, h0, c0, wb_packed, key, epsilon=EPSILON):
    """Run T epsilon-greedy LSTM steps in a single pallas_call.  xs: (T, B, 5)."""
    T, B, IN = xs.shape
    H = HIDDEN_SIZE
    assert IN == INPUT_SIZE

    # Randomness for the whole sequence in one shot (matches torch semantics:
    # one coin flip + one rand_like per gate per step).
    k_flip, k_rand = jax.random.split(key)
    flags = (jax.random.uniform(k_flip, (T, 3)) < epsilon).astype(jnp.int32)  # (T, 3)
    rand = jax.random.uniform(k_rand, (T, B, 3 * H), dtype=jnp.float32)       # (T, B, 3H)

    # [rand4 | mask4] slab; the last H lanes of each half are padding so a single
    # full-width select covers the f/i/o gates and leaves c_hat untouched.
    rand4 = jnp.concatenate([rand, jnp.zeros((T, B, H), jnp.float32)], axis=2)
    mask = jnp.repeat(flags.astype(jnp.float32), H, axis=1)                   # (T, 3H)
    mask = jnp.concatenate([mask, jnp.zeros((T, H), jnp.float32)], axis=1)    # (T, 4H)
    mask4 = jnp.broadcast_to(mask[:, None, :], (T, B, 4 * H))
    rm = jnp.concatenate([rand4, mask4], axis=2)                              # (T, B, 8H)

    x2 = xs.astype(jnp.float32).reshape(T * B, IN)                            # (T*B, IN)

    kernel = functools.partial(_eg_lstm_seq_kernel, seq_len=T, batch=B,
                               hidden_size=H, input_size=IN)

    grid_spec = pltpu.PrefetchScalarGridSpec(
        num_scalar_prefetch=0,
        grid=(1,),
        in_specs=[
            pl.BlockSpec((T * B, IN), lambda i: (0, 0)),                  # all x, resident
            pl.BlockSpec((T, B, 8 * H), lambda i: (0, 0, 0)),             # rand|mask slab
            pl.BlockSpec((H + IN + 1, 4 * H), lambda i: (0, 0)),          # packed W|b
            pl.BlockSpec((B, H), lambda i: (0, 0)),                       # h0
            pl.BlockSpec((B, H), lambda i: (0, 0)),                       # c0
        ],
        out_specs=[
            pl.BlockSpec((T, B, H), lambda i: (0, 0, 0)),                 # all h_t
            pl.BlockSpec((T, B, H), lambda i: (0, 0, 0)),                 # all c_t
        ],
    )

    hs, cs = pl.pallas_call(
        kernel,
        out_shape=(jax.ShapeDtypeStruct((T, B, H), jnp.float32),
                   jax.ShapeDtypeStruct((T, B, H), jnp.float32)),
        grid_spec=grid_spec,
        compiler_params=pltpu.CompilerParams(dimension_semantics=("arbitrary",)),
    )(x2, rm, wb_packed, h0.astype(jnp.float32), c0.astype(jnp.float32))

    return hs, cs, flags, rand


def epsilon_greedy_lstm_cell(x_t, hidden, wb_packed, key, epsilon=EPSILON):
    """Single-step forward (exactly the PyTorch module's forward) via the fused kernel, T=1."""
    h_t, c_t = hidden
    x2 = x_t.reshape(-1, INPUT_SIZE)
    h2 = h_t.reshape(-1, HIDDEN_SIZE)
    c2 = c_t.reshape(-1, HIDDEN_SIZE)
    hs, cs, flags, rand = epsilon_greedy_lstm_sequence(
        x2[None], h2, c2, wb_packed, key, epsilon)
    return hs[0], cs[0], flags[0], rand[0]


# ----------------------------- pure-JAX reference -----------------------------

def _reference_step(x, h, c, params, flags_t, rand_t):
    H = HIDDEN_SIZE
    w_f, b_f, w_i, b_i, w_o, b_o, w_c, b_c = params
    combined = jnp.concatenate([h, x], axis=1)
    f_t = jax.nn.sigmoid(combined @ w_f.T + b_f)
    i_t = jax.nn.sigmoid(combined @ w_i.T + b_i)
    o_t = jax.nn.sigmoid(combined @ w_o.T + b_o)
    c_hat = jnp.tanh(combined @ w_c.T + b_c)
    f_t = jnp.where(flags_t[0] == 1, rand_t[:, 0 * H:1 * H], f_t)
    i_t = jnp.where(flags_t[1] == 1, rand_t[:, 1 * H:2 * H], i_t)
    o_t = jnp.where(flags_t[2] == 1, rand_t[:, 2 * H:3 * H], o_t)
    c_new = f_t * c + i_t * c_hat
    return o_t * jnp.tanh(c_new), c_new


def _reference_seq(xs, h0, c0, params, flags, rand):
    h, c = h0, c0
    hs, cs = [], []
    for t in range(xs.shape[0]):
        h, c = _reference_step(xs[t], h, c, params, flags[t], rand[t])
        hs.append(h)
        cs.append(c)
    return jnp.stack(hs), jnp.stack(cs)


def init_params(key, input_size=INPUT_SIZE, hidden_size=HIDDEN_SIZE):
    """Deterministic nn.Linear-style init: U(-1/sqrt(fan_in), 1/sqrt(fan_in))."""
    fan_in = input_size + hidden_size
    bound = 1.0 / jnp.sqrt(jnp.float32(fan_in))
    keys = jax.random.split(key, 8)
    params = []
    for g in range(4):
        w = jax.random.uniform(keys[2 * g], (hidden_size, fan_in),
                               minval=-bound, maxval=bound, dtype=jnp.float32)
        b = jax.random.uniform(keys[2 * g + 1], (hidden_size,),
                               minval=-bound, maxval=bound, dtype=jnp.float32)
        params += [w, b]
    return tuple(params)  # (W_f, b_f, W_i, b_i, W_o, b_o, W_c, b_c)


if __name__ == "__main__":
    key = jax.random.PRNGKey(0)
    k_param, k_x, k_h, k_c, k_eps_seq, k_eps_step = jax.random.split(key, 6)

    B, T = 8, 8
    xs = jax.random.normal(k_x, (T, B, INPUT_SIZE), dtype=jnp.float32)
    h0 = jax.random.normal(k_h, (B, HIDDEN_SIZE), dtype=jnp.float32)
    c0 = jax.random.normal(k_c, (B, HIDDEN_SIZE), dtype=jnp.float32)

    params = init_params(k_param)
    wb_packed = pack_params(params)   # hoisted: packed once, reused by every call

    # Fused T-step recurrence in a single pallas_call / single grid step.
    hs, cs, flags, rand = epsilon_greedy_lstm_sequence(
        xs, h0, c0, wb_packed, k_eps_seq, epsilon=EPSILON)
    jax.block_until_ready((hs, cs))

    hs_ref, cs_ref = _reference_seq(xs, h0, c0, params, flags, rand)
    assert jnp.allclose(hs, hs_ref, atol=1e-5, rtol=1e-4)
    assert jnp.allclose(cs, cs_ref, atol=1e-5, rtol=1e-4)
    assert hs.shape == (T, B, HIDDEN_SIZE) and cs.shape == (T, B, HIDDEN_SIZE)

    # Single-step call == the PyTorch module's forward.
    h1, c1, flags1, rand1 = epsilon_greedy_lstm_cell(
        xs[0], (h0, c0), wb_packed, k_eps_step, epsilon=EPSILON)
    jax.block_until_ready((h1, c1))
    h1_ref, c1_ref = _reference_step(xs[0], h0, c0, params, flags1, rand1)
    assert jnp.allclose(h1, h1_ref, atol=1e-5, rtol=1e-4)
    assert jnp.allclose(c1, c1_ref, atol=1e-5, rtol=1e-4)
    assert h1.shape == (B, HIDDEN_SIZE) and c1.shape == (B, HIDDEN_SIZE)

    print("KERNEL_OK")
</pallas_src>

<mosaic_0001>
module attributes {stable_mosaic.version = 11 : i64} {
  func.func @_eg_lstm_seq_kernel(%arg0: i32, %arg1: memref<64x5xf32, #tpu.memory_space<vmem>>, %arg2: memref<8x8x16xf32, #tpu.memory_space<vmem>>, %arg3: memref<8x8xf32, #tpu.memory_space<vmem>>, %arg4: memref<8x2xf32, #tpu.memory_space<vmem>>, %arg5: memref<8x2xf32, #tpu.memory_space<vmem>>, %arg6: memref<8x8x2xf32, #tpu.memory_space<vmem>>, %arg7: memref<8x8x2xf32, #tpu.memory_space<vmem>>) attributes {dimension_semantics = [#tpu.dimension_semantics<arbitrary>], iteration_bounds = array<i64: 1>, scalar_prefetch = 0 : i64, scratch_operands = 0 : i64, tpu.core_type = #tpu.core_type<tc>, window_params = [{pipeline_mode = #tpu.pipeline_mode<synchronous>, transform_indices = @transform_0, window_bounds = array<i64: 64, 5>}, {pipeline_mode = #tpu.pipeline_mode<synchronous>, transform_indices = @transform_1, window_bounds = array<i64: 8, 8, 16>}, {pipeline_mode = #tpu.pipeline_mode<synchronous>, transform_indices = @transform_2, window_bounds = array<i64: 8, 8>}, {pipeline_mode = #tpu.pipeline_mode<synchronous>, transform_indices = @transform_3, window_bounds = array<i64: 8, 2>}, {pipeline_mode = #tpu.pipeline_mode<synchronous>, transform_indices = @transform_4, window_bounds = array<i64: 8, 2>}, {pipeline_mode = #tpu.pipeline_mode<synchronous>, transform_indices = @transform_5, window_bounds = array<i64: 8, 8, 2>}, {pipeline_mode = #tpu.pipeline_mode<synchronous>, transform_indices = @transform_6, window_bounds = array<i64: 8, 8, 2>}]} {
    %c0 = arith.constant 0 : index
    %c0_0 = arith.constant 0 : index
    %0 = vector.load %arg3[%c0, %c0_0] : memref<8x8xf32, #tpu.memory_space<vmem>>, vector<8x8xf32>
    %1 = vector.extract_strided_slice %0 {offsets = [0, 0], sizes = [2, 8], strides = [1, 1]} : vector<8x8xf32> to vector<2x8xf32>
    %2 = vector.extract_strided_slice %0 {offsets = [2, 0], sizes = [5, 8], strides = [1, 1]} : vector<8x8xf32> to vector<5x8xf32>
    %3 = vector.extract_strided_slice %0 {offsets = [7, 0], sizes = [1, 8], strides = [1, 1]} : vector<8x8xf32> to vector<1x8xf32>
    %c0_1 = arith.constant 0 : index
    %c0_2 = arith.constant 0 : index
    %4 = vector.load %arg1[%c0_1, %c0_2] : memref<64x5xf32, #tpu.memory_space<vmem>>, vector<64x5xf32>
    %cst = arith.constant dense<0.000000e+00> : vector<64x8xf32>
    %5 = tpu.matmul %4, %2, %cst {dimension_numbers = #tpu.dot_dimension_numbers<[1], [0], [0], [1], [0, 0, 1, 1], [], []>} : vector<64x5xf32>, vector<5x8xf32>, vector<64x8xf32> -> vector<64x8xf32>
    %6 = vector.broadcast %3 : vector<1x8xf32> to vector<64x8xf32>
    %7 = arith.addf %5, %6 : vector<64x8xf32>
    %c0_3 = arith.constant 0 : index
    %c0_4 = arith.constant 0 : index
    %c0_5 = arith.constant 0 : index
    %8 = vector.load %arg2[%c0_3, %c0_4, %c0_5] : memref<8x8x16xf32, #tpu.memory_space<vmem>>, vector<8x8x16xf32>
    %9 = tpu.iota {dimensions = array<i32: 1>} : vector<8x8xi32>
    %c6_i32 = arith.constant 6 : i32
    %10 = vector.broadcast %c6_i32 : i32 to vector<8x8xi32>
    %11 = arith.cmpi sge, %9, %10 : vector<8x8xi32>
    %c0_6 = arith.constant 0 : index
    %c0_7 = arith.constant 0 : index
    %12 = vector.load %arg4[%c0_6, %c0_7] : memref<8x2xf32, #tpu.memory_space<vmem>>, vector<8x2xf32>
    %c0_8 = arith.constant 0 : index
    %c0_9 = arith.constant 0 : index
    %13 = vector.load %arg5[%c0_8, %c0_9] : memref<8x2xf32, #tpu.memory_space<vmem>>, vector<8x2xf32>
    %14 = vector.extract_strided_slice %7 {offsets = [0, 0], sizes = [8, 8], strides = [1, 1]} : vector<64x8xf32> to vector<8x8xf32>
    %cst_10 = arith.constant dense<0.000000e+00> : vector<8x8xf32>
    %15 = tpu.matmul %12, %1, %cst_10 {dimension_numbers = #tpu.dot_dimension_numbers<[1], [0], [0], [1], [0, 0, 1, 1], [], []>} : vector<8x2xf32>, vector<2x8xf32>, vector<8x8xf32> -> vector<8x8xf32>
    %16 = arith.addf %14, %15 : vector<8x8xf32>
    %17 = math.tanh %16 : vector<8x8xf32>
    %18 = arith.negf %16 : vector<8x8xf32>
    %19 = math.exp %18 : vector<8x8xf32>
    %cst_11 = arith.constant 1.000000e+00 : f32
    %20 = vector.broadcast %cst_11 : f32 to vector<8x8xf32>
    %21 = arith.addf %20, %19 : vector<8x8xf32>
    %22 = arith.divf %20, %21 : vector<8x8xf32>
    %23 = arith.select %11, %17, %22 : vector<8x8xi1>, vector<8x8xf32>
    %24 = vector.extract_strided_slice %8 {offsets = [0, 0, 0], sizes = [1, 8, 8], strides = [1, 1, 1]} : vector<8x8x16xf32> to vector<1x8x8xf32>
    %25 = vector.shape_cast %24 : vector<1x8x8xf32> to vector<8x8xf32>
    %26 = vector.extract_strided_slice %8 {offsets = [0, 0, 8], sizes = [1, 8, 8], strides = [1, 1, 1]} : vector<8x8x16xf32> to vector<1x8x8xf32>
    %27 = vector.shape_cast %26 : vector<1x8x8xf32> to vector<8x8xf32>
    %cst_12 = arith.constant 0.000000e+00 : f32
    %28 = vector.broadcast %cst_12 : f32 to vector<8x8xf32>
    %29 = arith.cmpf ogt, %27, %28 : vector<8x8xf32>
    %30 = arith.select %29, %25, %23 : vector<8x8xi1>, vector<8x8xf32>
    %31 = vector.extract_strided_slice %30 {offsets = [0, 0], sizes = [8, 2], strides = [1, 1]} : vector<8x8xf32> to vector<8x2xf32>
    %32 = vector.extract_strided_slice %30 {offsets = [0, 2], sizes = [8, 2], strides = [1, 1]} : vector<8x8xf32> to vector<8x2xf32>
    %33 = vector.extract_strided_slice %30 {offsets = [0, 4], sizes = [8, 2], strides = [1, 1]} : vector<8x8xf32> to vector<8x2xf32>
    %34 = vector.extract_strided_slice %30 {offsets = [0, 6], sizes = [8, 2], strides = [1, 1]} : vector<8x8xf32> to vector<8x2xf32>
    %35 = arith.mulf %31, %13 : vector<8x2xf32>
    %36 = arith.mulf %32, %34 : vector<8x2xf32>
    %37 = arith.addf %35, %36 : vector<8x2xf32>
    %38 = math.tanh %37 : vector<8x2xf32>
    %39 = arith.mulf %33, %38 : vector<8x2xf32>
    %c0_13 = arith.constant 0 : index
    %c0_14 = arith.constant 0 : index
    %c0_15 = arith.constant 0 : index
    %40 = vector.load %arg6[%c0_13, %c0_14, %c0_15] : memref<8x8x2xf32, #tpu.memory_space<vmem>>, vector<1x8x2xf32>
    %41 = vector.shape_cast %40 : vector<1x8x2xf32> to vector<8x2xf32>
    %42 = vector.shape_cast %39 : vector<8x2xf32> to vector<1x8x2xf32>
    tpu.vector_store %arg6[%c0_13, %c0_14, %c0_15], %42 {strides = array<i32>} : memref<8x8x2xf32, #tpu.memory_space<vmem>>, vector<1x8x2xf32>,
    %c0_16 = arith.constant 0 : index
    %c0_17 = arith.constant 0 : index
    %c0_18 = arith.constant 0 : index
    %43 = vector.load %arg7[%c0_16, %c0_17, %c0_18] : memref<8x8x2xf32, #tpu.memory_space<vmem>>, vector<1x8x2xf32>
    %44 = vector.shape_cast %43 : vector<1x8x2xf32> to vector<8x2xf32>
    %45 = vector.shape_cast %37 : vector<8x2xf32> to vector<1x8x2xf32>
    tpu.vector_store %arg7[%c0_16, %c0_17, %c0_18], %45 {strides = array<i32>} : memref<8x8x2xf32, #tpu.memory_space<vmem>>, vector<1x8x2xf32>,
    %46 = vector.extract_strided_slice %7 {offsets = [8, 0], sizes = [8, 8], strides = [1, 1]} : vector<64x8xf32> to vector<8x8xf32>
    %cst_19 = arith.constant dense<0.000000e+00> : vector<8x8xf32>
    %47 = tpu.matmul %39, %1, %cst_19 {dimension_numbers = #tpu.dot_dimension_numbers<[1], [0], [0], [1], [0, 0, 1, 1], [], []>} : vector<8x2xf32>, vector<2x8xf32>, vector<8x8xf32> -> vector<8x8xf32>
    %48 = arith.addf %46, %47 : vector<8x8xf32>
    %49 = math.tanh %48 : vector<8x8xf32>
    %50 = arith.negf %48 : vector<8x8xf32>
    %51 = math.exp %50 : vector<8x8xf32>
    %cst_20 = arith.constant 1.000000e+00 : f32
    %52 = vector.broadcast %cst_20 : f32 to vector<8x8xf32>
    %53 = arith.addf %52, %51 : vector<8x8xf32>
    %54 = arith.divf %52, %53 : vector<8x8xf32>
    %55 = arith.select %11, %49, %54 : vector<8x8xi1>, vector<8x8xf32>
    %56 = vector.extract_strided_slice %8 {offsets = [1, 0, 0], sizes = [1, 8, 8], strides = [1, 1, 1]} : vector<8x8x16xf32> to vector<1x8x8xf32>
    %57 = vector.shape_cast %56 : vector<1x8x8xf32> to vector<8x8xf32>
    %58 = vector.extract_strided_slice %8 {offsets = [1, 0, 8], sizes = [1, 8, 8], strides = [1, 1, 1]} : vector<8x8x16xf32> to vector<1x8x8xf32>
    %59 = vector.shape_cast %58 : vector<1x8x8xf32> to vector<8x8xf32>
    %cst_21 = arith.constant 0.000000e+00 : f32
    %60 = vector.broadcast %cst_21 : f32 to vector<8x8xf32>
    %61 = arith.cmpf ogt, %59, %60 : vector<8x8xf32>
    %62 = arith.select %61, %57, %55 : vector<8x8xi1>, vector<8x8xf32>
    %63 = vector.extract_strided_slice %62 {offsets = [0, 0], sizes = [8, 2], strides = [1, 1]} : vector<8x8xf32> to vector<8x2xf32>
    %64 = vector.extract_strided_slice %62 {offsets = [0, 2], sizes = [8, 2], strides = [1, 1]} : vector<8x8xf32> to vector<8x2xf32>
    %65 = vector.extract_strided_slice %62 {offsets = [0, 4], sizes = [8, 2], strides = [1, 1]} : vector<8x8xf32> to vector<8x2xf32>
    %66 = vector.extract_strided_slice %62 {offsets = [0, 6], sizes = [8, 2], strides = [1, 1]} : vector<8x8xf32> to vector<8x2xf32>
    %67 = arith.mulf %63, %37 : vector<8x2xf32>
    %68 = arith.mulf %64, %66 : vector<8x2xf32>
    %69 = arith.addf %67, %68 : vector<8x2xf32>
    %70 = math.tanh %69 : vector<8x2xf32>
    %71 = arith.mulf %65, %70 : vector<8x2xf32>
    %c1 = arith.constant 1 : index
    %c0_22 = arith.constant 0 : index
    %c0_23 = arith.constant 0 : index
    %72 = vector.load %arg6[%c1, %c0_22, %c0_23] : memref<8x8x2xf32, #tpu.memory_space<vmem>>, vector<1x8x2xf32>
    %73 = vector.shape_cast %72 : vector<1x8x2xf32> to vector<8x2xf32>
    %74 = vector.shape_cast %71 : vector<8x2xf32> to vector<1x8x2xf32>
    tpu.vector_store %arg6[%c1, %c0_22, %c0_23], %74 {strides = array<i32>} : memref<8x8x2xf32, #tpu.memory_space<vmem>>, vector<1x8x2xf32>,
    %c1_24 = arith.constant 1 : index
    %c0_25 = arith.constant 0 : index
    %c0_26 = arith.constant 0 : index
    %75 = vector.load %arg7[%c1_24, %c0_25, %c0_26] : memref<8x8x2xf32, #tpu.memory_space<vmem>>, vector<1x8x2xf32>
    %76 = vector.shape_cast %75 : vector<1x8x2xf32> to vector<8x2xf32>
    %77 = vector.shape_cast %69 : vector<8x2xf32> to vector<1x8x2xf32>
    tpu.vector_store %arg7[%c1_24, %c0_25, %c0_26], %77 {strides = array<i32>} : memref<8x8x2xf32, #tpu.memory_space<vmem>>, vector<1x8x2xf32>,
    %78 = vector.extract_strided_slice %7 {offsets = [16, 0], sizes = [8, 8], strides = [1, 1]} : vector<64x8xf32> to vector<8x8xf32>
    %cst_27 = arith.constant dense<0.000000e+00> : vector<8x8xf32>
    %79 = tpu.matmul %71, %1, %cst_27 {dimension_numbers = #tpu.dot_dimension_numbers<[1], [0], [0], [1], [0, 0, 1, 1], [], []>} : vector<8x2xf32>, vector<2x8xf32>, vector<8x8xf32> -> vector<8x8xf32>
    %80 = arith.addf %78, %79 : vector<8x8xf32>
    %81 = math.tanh %80 : vector<8x8xf32>
    %82 = arith.negf %80 : vector<8x8xf32>
    %83 = math.exp %82 : vector<8x8xf32>
    %cst_28 = arith.constant 1.000000e+00 : f32
    %84 = vector.broadcast %cst_28 : f32 to vector<8x8xf32>
    %85 = arith.addf %84, %83 : vector<8x8xf32>
    %86 = arith.divf %84, %85 : vector<8x8xf32>
    %87 = arith.select %11, %81, %86 : vector<8x8xi1>, vector<8x8xf32>
    %88 = vector.extract_strided_slice %8 {offsets = [2, 0, 0], sizes = [1, 8, 8], strides = [1, 1, 1]} : vector<8x8x16xf32> to vector<1x8x8xf32>
    %89 = vector.shape_cast %88 : vector<1x8x8xf32> to vector<8x8xf32>
    %90 = vector.extract_strided_slice %8 {offsets = [2, 0, 8], sizes = [1, 8, 8], strides = [1, 1, 1]} : vector<8x8x16xf32> to vector<1x8x8xf32>
    %91 = vector.shape_cast %90 : vector<1x8x8xf32> to vector<8x8xf32>
    %cst_29 = arith.constant 0.000000e+00 : f32
    %92 = vector.broadcast %cst_29 : f32 to vector<8x8xf32>
    %93 = arith.cmpf ogt, %91, %92 : vector<8x8xf32>
    %94 = arith.select %93, %89, %87 : vector<8x8xi1>, vector<8x8xf32>
    %95 = vector.extract_strided_slice %94 {offsets = [0, 0], sizes = [8, 2], strides = [1, 1]} : vector<8x8xf32> to vector<8x2xf32>
    %96 = vector.extract_strided_slice %94 {offsets = [0, 2], sizes = [8, 2], strides = [1, 1]} : vector<8x8xf32> to vector<8x2xf32>
    %97 = vector.extract_strided_slice %94 {offsets = [0, 4], sizes = [8, 2], strides = [1, 1]} : vector<8x8xf32> to vector<8x2xf32>
    %98 = vector.extract_strided_slice %94 {offsets = [0, 6], sizes = [8, 2], strides = [1, 1]} : vector<8x8xf32> to vector<8x2xf32>
    %99 = arith.mulf %95, %69 : vector<8x2xf32>
    %100 = arith.mulf %96, %98 : vector<8x2xf32>
    %101 = arith.addf %99, %100 : vector<8x2xf32>
    %102 = math.tanh %101 : vector<8x2xf32>
    %103 = arith.mulf %97, %102 : vector<8x2xf32>
    %c2 = arith.constant 2 : index
    %c0_30 = arith.constant 0 : index
    %c0_31 = arith.constant 0 : index
    %104 = vector.load %arg6[%c2, %c0_30, %c0_31] : memref<8x8x2xf32, #tpu.memory_space<vmem>>, vector<1x8x2xf32>
    %105 = vector.shape_cast %104 : vector<1x8x2xf32> to vector<8x2xf32>
    %106 = vector.shape_cast %103 : vector<8x2xf32> to vector<1x8x2xf32>
    tpu.vector_store %arg6[%c2, %c0_30, %c0_31], %106 {strides = array<i32>} : memref<8x8x2xf32, #tpu.memory_space<vmem>>, vector<1x8x2xf32>,
    %c2_32 = arith.constant 2 : index
    %c0_33 = arith.constant 0 : index
    %c0_34 = arith.constant 0 : index
    %107 = vector.load %arg7[%c2_32, %c0_33, %c0_34] : memref<8x8x2xf32, #tpu.memory_space<vmem>>, vector<1x8x2xf32>
    %108 = vector.shape_cast %107 : vector<1x8x2xf32> to vector<8x2xf32>
    %109 = vector.shape_cast %101 : vector<8x2xf32> to vector<1x8x2xf32>
    tpu.vector_store %arg7[%c2_32, %c0_33, %c0_34], %109 {strides = array<i32>} : memref<8x8x2xf32, #tpu.memory_space<vmem>>, vector<1x8x2xf32>,
    %110 = vector.extract_strided_slice %7 {offsets = [24, 0], sizes = [8, 8], strides = [1, 1]} : vector<64x8xf32> to vector<8x8xf32>
    %cst_35 = arith.constant dense<0.000000e+00> : vector<8x8xf32>
    %111 = tpu.matmul %103, %1, %cst_35 {dimension_numbers = #tpu.dot_dimension_numbers<[1], [0], [0], [1], [0, 0, 1, 1], [], []>} : vector<8x2xf32>, vector<2x8xf32>, vector<8x8xf32> -> vector<8x8xf32>
    %112 = arith.addf %110, %111 : vector<8x8xf32>
    %113 = math.tanh %112 : vector<8x8xf32>
    %114 = arith.negf %112 : vector<8x8xf32>
    %115 = math.exp %114 : vector<8x8xf32>
    %cst_36 = arith.constant 1.000000e+00 : f32
    %116 = vector.broadcast %cst_36 : f32 to vector<8x8xf32>
    %117 = arith.addf %116, %115 : vector<8x8xf32>
    %118 = arith.divf %116, %117 : vector<8x8xf32>
    %119 = arith.select %11, %113, %118 : vector<8x8xi1>, vector<8x8xf32>
    %120 = vector.extract_strided_slice %8 {offsets = [3, 0, 0], sizes = [1, 8, 8], strides = [1, 1, 1]} : vector<8x8x16xf32> to vector<1x8x8xf32>
    %121 = vector.shape_cast %120 : vector<1x8x8xf32> to vector<8x8xf32>
    %122 = vector.extract_strided_slice %8 {offsets = [3, 0, 8], sizes = [1, 8, 8], strides = [1, 1, 1]} : vector<8x8x16xf32> to vector<1x8x8xf32>
    %123 = vector.shape_cast %122 : vector<1x8x8xf32> to vector<8x8xf32>
    %cst_37 = arith.constant 0.000000e+00 : f32
    %124 = vector.broadcast %cst_37 : f32 to vector<8x8xf32>
    %125 = arith.cmpf ogt, %123, %124 : vector<8x8xf32>
    %126 = arith.select %125, %121, %119 : vector<8x8xi1>, vector<8x8xf32>
    %127 = vector.extract_strided_slice %126 {offsets = [0, 0], sizes = [8, 2], strides = [1, 1]} : vector<8x8xf32> to vector<8x2xf32>
    %128 = vector.extract_strided_slice %126 {offsets = [0, 2], sizes = [8, 2], strides = [1, 1]} : vector<8x8xf32> to vector<8x2xf32>
    %129 = vector.extract_strided_slice %126 {offsets = [0, 4], sizes = [8, 2], strides = [1, 1]} : vector<8x8xf32> to vector<8x2xf32>
    %130 = vector.extract_strided_slice %126 {offsets = [0, 6], sizes = [8, 2], strides = [1, 1]} : vector<8x8xf32> to vector<8x2xf32>
    %131 = arith.mulf %127, %101 : vector<8x2xf32>
    %132 = arith.mulf %128, %130 : vector<8x2xf32>
    %133 = arith.addf %131, %132 : vector<8x2xf32>
    %134 = math.tanh %133 : vector<8x2xf32>
    %135 = arith.mulf %129, %134 : vector<8x2xf32>
    %c3 = arith.constant 3 : index
    %c0_38 = arith.constant 0 : index
    %c0_39 = arith.constant 0 : index
    %136 = vector.load %arg6[%c3, %c0_38, %c0_39] : memref<8x8x2xf32, #tpu.memory_space<vmem>>, vector<1x8x2xf32>
    %137 = vector.shape_cast %136 : vector<1x8x2xf32> to vector<8x2xf32>
    %138 = vector.shape_cast %135 : vector<8x2xf32> to vector<1x8x2xf32>
    tpu.vector_store %arg6[%c3, %c0_38, %c0_39], %138 {strides = array<i32>} : memref<8x8x2xf32, #tpu.memory_space<vmem>>, vector<1x8x2xf32>,
    %c3_40 = arith.constant 3 : index
    %c0_41 = arith.constant 0 : index
    %c0_42 = arith.constant 0 : index
    %139 = vector.load %arg7[%c3_40, %c0_41, %c0_42] : memref<8x8x2xf32, #tpu.memory_space<vmem>>, vector<1x8x2xf32>
    %140 = vector.shape_cast %139 : vector<1x8x2xf32> to vector<8x2xf32>
    %141 = vector.shape_cast %133 : vector<8x2xf32> to vector<1x8x2xf32>
    tpu.vector_store %arg7[%c3_40, %c0_41, %c0_42], %141 {strides = array<i32>} : memref<8x8x2xf32, #tpu.memory_space<vmem>>, vector<1x8x2xf32>,
    %142 = vector.extract_strided_slice %7 {offsets = [32, 0], sizes = [8, 8], strides = [1, 1]} : vector<64x8xf32> to vector<8x8xf32>
    %cst_43 = arith.constant dense<0.000000e+00> : vector<8x8xf32>
    %143 = tpu.matmul %135, %1, %cst_43 {dimension_numbers = #tpu.dot_dimension_numbers<[1], [0], [0], [1], [0, 0, 1, 1], [], []>} : vector<8x2xf32>, vector<2x8xf32>, vector<8x8xf32> -> vector<8x8xf32>
    %144 = arith.addf %142, %143 : vector<8x8xf32>
    %145 = math.tanh %144 : vector<8x8xf32>
    %146 = arith.negf %144 : vector<8x8xf32>
    %147 = math.exp %146 : vector<8x8xf32>
    %cst_44 = arith.constant 1.000000e+00 : f32
    %148 = vector.broadcast %cst_44 : f32 to vector<8x8xf32>
    %149 = arith.addf %148, %147 : vector<8x8xf32>
    %150 = arith.divf %148, %149 : vector<8x8xf32>
    %151 = arith.select %11, %145, %150 : vector<8x8xi1>, vector<8x8xf32>
    %152 = vector.extract_strided_slice %8 {offsets = [4, 0, 0], sizes = [1, 8, 8], strides = [1, 1, 1]} : vector<8x8x16xf32> to vector<1x8x8xf32>
    %153 = vector.shape_cast %152 : vector<1x8x8xf32> to vector<8x8xf32>
    %154 = vector.extract_strided_slice %8 {offsets = [4, 0, 8], sizes = [1, 8, 8], strides = [1, 1, 1]} : vector<8x8x16xf32> to vector<1x8x8xf32>
    %155 = vector.shape_cast %154 : vector<1x8x8xf32> to vector<8x8xf32>
    %cst_45 = arith.constant 0.000000e+00 : f32
    %156 = vector.broadcast %cst_45 : f32 to vector<8x8xf32>
    %157 = arith.cmpf ogt, %155, %156 : vector<8x8xf32>
    %158 = arith.select %157, %153, %151 : vector<8x8xi1>, vector<8x8xf32>
    %159 = vector.extract_strided_slice %158 {offsets = [0, 0], sizes = [8, 2], strides = [1, 1]} : vector<8x8xf32> to vector<8x2xf32>
    %160 = vector.extract_strided_slice %158 {offsets = [0, 2], sizes = [8, 2], strides = [1, 1]} : vector<8x8xf32> to vector<8x2xf32>
    %161 = vector.extract_strided_slice %158 {offsets = [0, 4], sizes = [8, 2], strides = [1, 1]} : vector<8x8xf32> to vector<8x2xf32>
    %162 = vector.extract_strided_slice %158 {offsets = [0, 6], sizes = [8, 2], strides = [1, 1]} : vector<8x8xf32> to vector<8x2xf32>
    %163 = arith.mulf %159, %133 : vector<8x2xf32>
    %164 = arith.mulf %160, %162 : vector<8x2xf32>
    %165 = arith.addf %163, %164 : vector<8x2xf32>
    %166 = math.tanh %165 : vector<8x2xf32>
    %167 = arith.mulf %161, %166 : vector<8x2xf32>
    %c4 = arith.constant 4 : index
    %c0_46 = arith.constant 0 : index
    %c0_47 = arith.constant 0 : index
    %168 = vector.load %arg6[%c4, %c0_46, %c0_47] : memref<8x8x2xf32, #tpu.memory_space<vmem>>, vector<1x8x2xf32>
    %169 = vector.shape_cast %168 : vector<1x8x2xf32> to vector<8x2xf32>
    %170 = vector.shape_cast %167 : vector<8x2xf32> to vector<1x8x2xf32>
    tpu.vector_store %arg6[%c4, %c0_46, %c0_47], %170 {strides = array<i32>} : memref<8x8x2xf32, #tpu.memory_space<vmem>>, vector<1x8x2xf32>,
    %c4_48 = arith.constant 4 : index
    %c0_49 = arith.constant 0 : index
    %c0_50 = arith.constant 0 : index
    %171 = vector.load %arg7[%c4_48, %c0_49, %c0_50] : memref<8x8x2xf32, #tpu.memory_space<vmem>>, vector<1x8x2xf32>
    %172 = vector.shape_cast %171 : vector<1x8x2xf32> to vector<8x2xf32>
    %173 = vector.shape_cast %165 : vector<8x2xf32> to vector<1x8x2xf32>
    tpu.vector_store %arg7[%c4_48, %c0_49, %c0_50], %173 {strides = array<i32>} : memref<8x8x2xf32, #tpu.memory_space<vmem>>, vector<1x8x2xf32>,
    %174 = vector.extract_strided_slice %7 {offsets = [40, 0], sizes = [8, 8], strides = [1, 1]} : vector<64x8xf32> to vector<8x8xf32>
    %cst_51 = arith.constant dense<0.000000e+00> : vector<8x8xf32>
    %175 = tpu.matmul %167, %1, %cst_51 {dimension_numbers = #tpu.dot_dimension_numbers<[1], [0], [0], [1], [0, 0, 1, 1], [], []>} : vector<8x2xf32>, vector<2x8xf32>, vector<8x8xf32> -> vector<8x8xf32>
    %176 = arith.addf %174, %175 : vector<8x8xf32>
    %177 = math.tanh %176 : vector<8x8xf32>
    %178 = arith.negf %176 : vector<8x8xf32>
    %179 = math.exp %178 : vector<8x8xf32>
    %cst_52 = arith.constant 1.000000e+00 : f32
    %180 = vector.broadcast %cst_52 : f32 to vector<8x8xf32>
    %181 = arith.addf %180, %179 : vector<8x8xf32>
    %182 = arith.divf %180, %181 : vector<8x8xf32>
    %183 = arith.select %11, %177, %182 : vector<8x8xi1>, vector<8x8xf32>
    %184 = vector.extract_strided_slice %8 {offsets = [5, 0, 0], sizes = [1, 8, 8], strides = [1, 1, 1]} : vector<8x8x16xf32> to vector<1x8x8xf32>
    %185 = vector.shape_cast %184 : vector<1x8x8xf32> to vector<8x8xf32>
    %186 = vector.extract_strided_slice %8 {offsets = [5, 0, 8], sizes = [1, 8, 8], strides = [1, 1, 1]} : vector<8x8x16xf32> to vector<1x8x8xf32>
    %187 = vector.shape_cast %186 : vector<1x8x8xf32> to vector<8x8xf32>
    %cst_53 = arith.constant 0.000000e+00 : f32
    %188 = vector.broadcast %cst_53 : f32 to vector<8x8xf32>
    %189 = arith.cmpf ogt, %187, %188 : vector<8x8xf32>
    %190 = arith.select %189, %185, %183 : vector<8x8xi1>, vector<8x8xf32>
    %191 = vector.extract_strided_slice %190 {offsets = [0, 0], sizes = [8, 2], strides = [1, 1]} : vector<8x8xf32> to vector<8x2xf32>
    %192 = vector.extract_strided_slice %190 {offsets = [0, 2], sizes = [8, 2], strides = [1, 1]} : vector<8x8xf32> to vector<8x2xf32>
    %193 = vector.extract_strided_slice %190 {offsets = [0, 4], sizes = [8, 2], strides = [1, 1]} : vector<8x8xf32> to vector<8x2xf32>
    %194 = vector.extract_strided_slice %190 {offsets = [0, 6], sizes = [8, 2], strides = [1, 1]} : vector<8x8xf32> to vector<8x2xf32>
    %195 = arith.mulf %191, %165 : vector<8x2xf32>
    %196 = arith.mulf %192, %194 : vector<8x2xf32>
    %197 = arith.addf %195, %196 : vector<8x2xf32>
    %198 = math.tanh %197 : vector<8x2xf32>
    %199 = arith.mulf %193, %198 : vector<8x2xf32>
    %c5 = arith.constant 5 : index
    %c0_54 = arith.constant 0 : index
    %c0_55 = arith.constant 0 : index
    %200 = vector.load %arg6[%c5, %c0_54, %c0_55] : memref<8x8x2xf32, #tpu.memory_space<vmem>>, vector<1x8x2xf32>
    %201 = vector.shape_cast %200 : vector<1x8x2xf32> to vector<8x2xf32>
    %202 = vector.shape_cast %199 : vector<8x2xf32> to vector<1x8x2xf32>
    tpu.vector_store %arg6[%c5, %c0_54, %c0_55], %202 {strides = array<i32>} : memref<8x8x2xf32, #tpu.memory_space<vmem>>, vector<1x8x2xf32>,
    %c5_56 = arith.constant 5 : index
    %c0_57 = arith.constant 0 : index
    %c0_58 = arith.constant 0 : index
    %203 = vector.load %arg7[%c5_56, %c0_57, %c0_58] : memref<8x8x2xf32, #tpu.memory_space<vmem>>, vector<1x8x2xf32>
    %204 = vector.shape_cast %203 : vector<1x8x2xf32> to vector<8x2xf32>
    %205 = vector.shape_cast %197 : vector<8x2xf32> to vector<1x8x2xf32>
    tpu.vector_store %arg7[%c5_56, %c0_57, %c0_58], %205 {strides = array<i32>} : memref<8x8x2xf32, #tpu.memory_space<vmem>>, vector<1x8x2xf32>,
    %206 = vector.extract_strided_slice %7 {offsets = [48, 0], sizes = [8, 8], strides = [1, 1]} : vector<64x8xf32> to vector<8x8xf32>
    %cst_59 = arith.constant dense<0.000000e+00> : vector<8x8xf32>
    %207 = tpu.matmul %199, %1, %cst_59 {dimension_numbers = #tpu.dot_dimension_numbers<[1], [0], [0], [1], [0, 0, 1, 1], [], []>} : vector<8x2xf32>, vector<2x8xf32>, vector<8x8xf32> -> vector<8x8xf32>
    %208 = arith.addf %206, %207 : vector<8x8xf32>
    %209 = math.tanh %208 : vector<8x8xf32>
    %210 = arith.negf %208 : vector<8x8xf32>
    %211 = math.exp %210 : vector<8x8xf32>
    %cst_60 = arith.constant 1.000000e+00 : f32
    %212 = vector.broadcast %cst_60 : f32 to vector<8x8xf32>
    %213 = arith.addf %212, %211 : vector<8x8xf32>
    %214 = arith.divf %212, %213 : vector<8x8xf32>
    %215 = arith.select %11, %209, %214 : vector<8x8xi1>, vector<8x8xf32>
    %216 = vector.extract_strided_slice %8 {offsets = [6, 0, 0], sizes = [1, 8, 8], strides = [1, 1, 1]} : vector<8x8x16xf32> to vector<1x8x8xf32>
    %217 = vector.shape_cast %216 : vector<1x8x8xf32> to vector<8x8xf32>
    %218 = vector.extract_strided_slice %8 {offsets = [6, 0, 8], sizes = [1, 8, 8], strides = [1, 1, 1]} : vector<8x8x16xf32> to vector<1x8x8xf32>
    %219 = vector.shape_cast %218 : vector<1x8x8xf32> to vector<8x8xf32>
    %cst_61 = arith.constant 0.000000e+00 : f32
    %220 = vector.broadcast %cst_61 : f32 to vector<8x8xf32>
    %221 = arith.cmpf ogt, %219, %220 : vector<8x8xf32>
    %222 = arith.select %221, %217, %215 : vector<8x8xi1>, vector<8x8xf32>
    %223 = vector.extract_strided_slice %222 {offsets = [0, 0], sizes = [8, 2], strides = [1, 1]} : vector<8x8xf32> to vector<8x2xf32>
    %224 = vector.extract_strided_slice %222 {offsets = [0, 2], sizes = [8, 2], strides = [1, 1]} : vector<8x8xf32> to vector<8x2xf32>
    %225 = vector.extract_strided_slice %222 {offsets = [0, 4], sizes = [8, 2], strides = [1, 1]} : vector<8x8xf32> to vector<8x2xf32>
    %226 = vector.extract_strided_slice %222 {offsets = [0, 6], sizes = [8, 2], strides = [1, 1]} : vector<8x8xf32> to vector<8x2xf32>
    %227 = arith.mulf %223, %197 : vector<8x2xf32>
    %228 = arith.mulf %224, %226 : vector<8x2xf32>
    %229 = arith.addf %227, %228 : vector<8x2xf32>
    %230 = math.tanh %229 : vector<8x2xf32>
    %231 = arith.mulf %225, %230 : vector<8x2xf32>
    %c6 = arith.constant 6 : index
    %c0_62 = arith.constant 0 : index
    %c0_63 = arith.constant 0 : index
    %232 = vector.load %arg6[%c6, %c0_62, %c0_63] : memref<8x8x2xf32, #tpu.memory_space<vmem>>, vector<1x8x2xf32>
    %233 = vector.shape_cast %232 : vector<1x8x2xf32> to vector<8x2xf32>
    %234 = vector.shape_cast %231 : vector<8x2xf32> to vector<1x8x2xf32>
    tpu.vector_store %arg6[%c6, %c0_62, %c0_63], %234 {strides = array<i32>} : memref<8x8x2xf32, #tpu.memory_space<vmem>>, vector<1x8x2xf32>,
    %c6_64 = arith.constant 6 : index
    %c0_65 = arith.constant 0 : index
    %c0_66 = arith.constant 0 : index
    %235 = vector.load %arg7[%c6_64, %c0_65, %c0_66] : memref<8x8x2xf32, #tpu.memory_space<vmem>>, vector<1x8x2xf32>
    %236 = vector.shape_cast %235 : vector<1x8x2xf32> to vector<8x2xf32>
    %237 = vector.shape_cast %229 : vector<8x2xf32> to vector<1x8x2xf32>
    tpu.vector_store %arg7[%c6_64, %c0_65, %c0_66], %237 {strides = array<i32>} : memref<8x8x2xf32, #tpu.memory_space<vmem>>, vector<1x8x2xf32>,
    %238 = vector.extract_strided_slice %7 {offsets = [56, 0], sizes = [8, 8], strides = [1, 1]} : vector<64x8xf32> to vector<8x8xf32>
    %cst_67 = arith.constant dense<0.000000e+00> : vector<8x8xf32>
    %239 = tpu.matmul %231, %1, %cst_67 {dimension_numbers = #tpu.dot_dimension_numbers<[1], [0], [0], [1], [0, 0, 1, 1], [], []>} : vector<8x2xf32>, vector<2x8xf32>, vector<8x8xf32> -> vector<8x8xf32>
    %240 = arith.addf %238, %239 : vector<8x8xf32>
    %241 = math.tanh %240 : vector<8x8xf32>
    %242 = arith.negf %240 : vector<8x8xf32>
    %243 = math.exp %242 : vector<8x8xf32>
    %cst_68 = arith.constant 1.000000e+00 : f32
    %244 = vector.broadcast %cst_68 : f32 to vector<8x8xf32>
    %245 = arith.addf %244, %243 : vector<8x8xf32>
    %246 = arith.divf %244, %245 : vector<8x8xf32>
    %247 = arith.select %11, %241, %246 : vector<8x8xi1>, vector<8x8xf32>
    %248 = vector.extract_strided_slice %8 {offsets = [7, 0, 0], sizes = [1, 8, 8], strides = [1, 1, 1]} : vector<8x8x16xf32> to vector<1x8x8xf32>
    %249 = vector.shape_cast %248 : vector<1x8x8xf32> to vector<8x8xf32>
    %250 = vector.extract_strided_slice %8 {offsets = [7, 0, 8], sizes = [1, 8, 8], strides = [1, 1, 1]} : vector<8x8x16xf32> to vector<1x8x8xf32>
    %251 = vector.shape_cast %250 : vector<1x8x8xf32> to vector<8x8xf32>
    %cst_69 = arith.constant 0.000000e+00 : f32
    %252 = vector.broadcast %cst_69 : f32 to vector<8x8xf32>
    %253 = arith.cmpf ogt, %251, %252 : vector<8x8xf32>
    %254 = arith.select %253, %249, %247 : vector<8x8xi1>, vector<8x8xf32>
    %255 = vector.extract_strided_slice %254 {offsets = [0, 0], sizes = [8, 2], strides = [1, 1]} : vector<8x8xf32> to vector<8x2xf32>
    %256 = vector.extract_strided_slice %254 {offsets = [0, 2], sizes = [8, 2], strides = [1, 1]} : vector<8x8xf32> to vector<8x2xf32>
    %257 = vector.extract_strided_slice %254 {offsets = [0, 4], sizes = [8, 2], strides = [1, 1]} : vector<8x8xf32> to vector<8x2xf32>
    %258 = vector.extract_strided_slice %254 {offsets = [0, 6], sizes = [8, 2], strides = [1, 1]} : vector<8x8xf32> to vector<8x2xf32>
    %259 = arith.mulf %255, %229 : vector<8x2xf32>
    %260 = arith.mulf %256, %258 : vector<8x2xf32>
    %261 = arith.addf %259, %260 : vector<8x2xf32>
    %262 = math.tanh %261 : vector<8x2xf32>
    %263 = arith.mulf %257, %262 : vector<8x2xf32>
    %c7 = arith.constant 7 : index
    %c0_70 = arith.constant 0 : index
    %c0_71 = arith.constant 0 : index
    %264 = vector.load %arg6[%c7, %c0_70, %c0_71] : memref<8x8x2xf32, #tpu.memory_space<vmem>>, vector<1x8x2xf32>
    %265 = vector.shape_cast %264 : vector<1x8x2xf32> to vector<8x2xf32>
    %266 = vector.shape_cast %263 : vector<8x2xf32> to vector<1x8x2xf32>
    tpu.vector_store %arg6[%c7, %c0_70, %c0_71], %266 {strides = array<i32>} : memref<8x8x2xf32, #tpu.memory_space<vmem>>, vector<1x8x2xf32>,
    %c7_72 = arith.constant 7 : index
    %c0_73 = arith.constant 0 : index
    %c0_74 = arith.constant 0 : index
    %267 = vector.load %arg7[%c7_72, %c0_73, %c0_74] : memref<8x8x2xf32, #tpu.memory_space<vmem>>, vector<1x8x2xf32>
    %268 = vector.shape_cast %267 : vector<1x8x2xf32> to vector<8x2xf32>
    %269 = vector.shape_cast %261 : vector<8x2xf32> to vector<1x8x2xf32>
    tpu.vector_store %arg7[%c7_72, %c0_73, %c0_74], %269 {strides = array<i32>} : memref<8x8x2xf32, #tpu.memory_space<vmem>>, vector<1x8x2xf32>,
    return
  }
  func.func @transform_0(%arg0: i32) -> (i32, i32) {
    %c0_i32 = arith.constant 0 : i32
    %c0_i32_0 = arith.constant 0 : i32
    %c0_i32_1 = arith.constant 0 : i32
    return %c0_i32, %c0_i32_0 : i32, i32
  }
  func.func @transform_1(%arg0: i32) -> (i32, i32, i32) {
    %c0_i32 = arith.constant 0 : i32
    %c0_i32_0 = arith.constant 0 : i32
    %c0_i32_1 = arith.constant 0 : i32
    %c0_i32_2 = arith.constant 0 : i32
    return %c0_i32, %c0_i32_0, %c0_i32_1 : i32, i32, i32
  }
  func.func @transform_2(%arg0: i32) -> (i32, i32) {
    %c0_i32 = arith.constant 0 : i32
    %c0_i32_0 = arith.constant 0 : i32
    %c0_i32_1 = arith.constant 0 : i32
    return %c0_i32, %c0_i32_0 : i32, i32
  }
  func.func @transform_3(%arg0: i32) -> (i32, i32) {
    %c0_i32 = arith.constant 0 : i32
    %c0_i32_0 = arith.constant 0 : i32
    %c0_i32_1 = arith.constant 0 : i32
    return %c0_i32, %c0_i32_0 : i32, i32
  }
  func.func @transform_4(%arg0: i32) -> (i32, i32) {
    %c0_i32 = arith.constant 0 : i32
    %c0_i32_0 = arith.constant 0 : i32
    %c0_i32_1 = arith.constant 0 : i32
    return %c0_i32, %c0_i32_0 : i32, i32
  }
  func.func @transform_5(%arg0: i32) -> (i32, i32, i32) {
    %c0_i32 = arith.constant 0 : i32
    %c0_i32_0 = arith.constant 0 : i32
    %c0_i32_1 = arith.constant 0 : i32
    %c0_i32_2 = arith.constant 0 : i32
    return %c0_i32, %c0_i32_0, %c0_i32_1 : i32, i32, i32
  }
  func.func @transform_6(%arg0: i32) -> (i32, i32, i32) {
    %c0_i32 = arith.constant 0 : i32
    %c0_i32_0 = arith.constant 0 : i32
    %c0_i32_1 = arith.constant 0 : i32
    %c0_i32_2 = arith.constant 0 : i32
    return %c0_i32, %c0_i32_0, %c0_i32_1 : i32, i32, i32
  }
}

</mosaic_0001>

<bundles_post_ra>
// kernel: tpu_custom_call.1
= control target key start
LH: loop header
LB: loop body
LE: loop exit
PB: predicated region body
PF: predicated region fallthrough
CT: control target
= control target key end

     0   :  { %vm37_vm0 = vcmask 39936   ;;  %vm187_vm1 = vcmask 1041408   ;;  %vm62_vm2 = vcmask 1044480   ;;  %v1356_v2 = vmov 0.0   ;;  %s1358_s29 = smov 8   ;;  %s1359_s30 = smov 124   ;;  %s1694_s2 = inlined_call_operand.vmem [shape: f32[8,8], index: 2, kind: input, shape index: {}]   ;;  %s1695_s0 = inlined_call_operand.vmem [shape: f32[64,5], index: 0, kind: input, shape index: {}]   ;;  %s1696_s3 = inlined_call_operand.vmem [shape: f32[8,2], index: 3, kind: input, shape index: {}]   ;;  %s1697_s1 = inlined_call_operand.vmem [shape: f32[8,8,16], index: 1, kind: input, shape index: {}]   ;;  %s1698_s4 = inlined_call_operand.vmem [shape: f32[8,2], index: 4, kind: input, shape index: {}]   ;;  %s1699_s5 = inlined_call_operand.vmem [shape: f32[8,8,2], index: 5, kind: output, shape index: {0}]   ;;  %s1700_s6 = inlined_call_operand.vmem [shape: f32[8,8,2], index: 6, kind: output, shape index: {1}]  }
   0x1   :  { %v1402_v0 = vld [vmem:[%s1694_s2] sm:$0xff]  ;;  %1244 = vmatprep.subr.mxu1 %v1356_v2  ;;  %vm183_vm3 = vcmask 15360   ;;  %v24_v5 = vld [vmem:[%s1695_s0 + $0x8] sm:$0xff]  ;;  %vm1357_vm4 = vmmov 0   ;;  %v31_v7 = vlaneseq  ;;  %s1360_s9 = smov 126   ;;  %s1361_s10 = smov 4  }
   0x2   :  { %v23_v1 = vld [vmem:[%s1695_s0] sm:$0xff]  ;;  %v36_v3 = vrot.slane %v1402_v0, 2  ;;  %1245 = vmatpush3.msk.msra.mxu1 %vm187_vm1, %v1402_v0  ;;  %1246 = vmatprep.mubr.msk.f32.mxu1 %vm1357_vm4, %v1356_v2  ;;  %v171_v38 = vld [vmem:[%s1697_s1 + $0x8] sm:$0xff]  ;;  %v25_v57 = vld [vmem:[%s1695_s0 + $0x10] sm:$0xff] }
   0x3   :  { %1232 = vmatprep.mubr.msk.f32.mxu0 %vm37_vm0, %v23_v1  ;;  %v181_v4 = vld [vmem:[%s1696_s3] sm:$0xff]  ;;  %1249 = vmatprep.subr.mxu1 %v1356_v2  ;;  %v32_v8 = vshrl.u32 %v31_v7, 7  ;;  %v1440_v20 = vand.u32 127, %v31_v7  ;;  %vm391_vm7 = vcmp.gt.f32.partialorder %v171_v38, 0.0  ;;  %v26_v58 = vld [vmem:[%s1695_s0 + $0x18] sm:$0xff]  ;;  %v172_v63 = vld [vmem:[%s1697_s1 + $0x10] sm:$0xff] }
   0x4   :  { %1230 = vmatprep.subr.msk.mxu0 %vm62_vm2, %v36_v3  ;;  %1247 = vmatmul.mubr.msk.f32.vlgmr.msra.gmra.mxu1 %vm183_vm3, %v181_v4  ;;  %v170_v6 = vld [vmem:[%s1697_s1] sm:$0xff]  ;;  %vm511_vm8 = vcmp.gt.f32.partialorder %v172_v63, 0.0 }
   0x5   :  { %1231 = vmatpush3.msk.msra.mxu0 %vm62_vm2, %v36_v3  ;;  %1250 = vmatpush3.msk.msra.mxu1 %vm187_vm1, %v1402_v0  ;;  %v33_v9 = vsub.s32 7, %v32_v8  ;;  %vm180_vm5 = vcmp.ge.s32.totalorder %v1440_v20, 6  ;;  %vm269_vm6 = vcmp.gt.f32.partialorder %v170_v6, 0.0  ;;  %v182_v27 = vld [vmem:[%s1698_s4] sm:$0xff]  ;;  %s1362_s4 = smov 116  }
   0x6   :  { %1233 = vmatmul.mubr.msk.f32.vlgmr.msra.gmra.mxu0 %vm37_vm0, %v24_v5  ;;  %1251 = vmatprep.mubr.msk.f32.mxu1 %vm1357_vm4, %v1356_v2 }
   0x7   :  { %1254 = vmatprep.subr.mxu1 %v1356_v2  ;;  %1264 = vmatprep.subr.mxu0 %v1356_v2  ;;  %v1437_v13 = vrot.slane %v1402_v0, %v33_v9 }
   0x8   :  { %1265 = vmatpush3.msk.msra.mxu0 %vm187_vm1, %v1402_v0  ;;  %271 = vrot.lane.b32.xlu0 %v170_v6, %s1358_s29 }
   0x9   :  { %1274 = vmatprep.subr.mxu0 %v1356_v2  ;;  %1235 = vmatprep.mubr.msk.f32.mxu0 %vm37_vm0, %v25_v57  ;;  %v174_v57 = vld [vmem:[%s1697_s1 + $0x20] sm:$0xff] }
   0xa   :  { %1236 = vmatmul.mubr.msk.f32.gmra.mxu0 %vm37_vm0, %v26_v58  ;;  %vm751_vm10 = vcmp.gt.f32.partialorder %v174_v57, 0.0 }
  0x7a   :  { %v272_v24 = vpop.permute.xlu0 %271 }
  0xc4   :  { %v256_v10 = vpop.f32.mrf.mxu1 }
  0xc6   :  { %v1234_v11 = vpop.f32.mrf.mxu0  ;;  %v1248_v12 = vpop.f32.mrf.mxu1 }
  0xc7   :  { %v137_v39 = vadd.f32 %v1234_v11, %v1437_v13 }
  0xc8   :  { %v131_v14 = vpop.f32.mrf.mxu0 }
  0xc9   :  { %v132_v15 = vadd.f32 %v131_v14, %v1437_v13 }
  0xca   :  { %v1237_v1 = vpop.f32.mrf.mxu0 }
  0xcb   :  { %v260_v16 = vadd.f32 %v256_v10, %v132_v15 }
  0xcc   :  { %v141_v3 = vpop.f32.mrf.mxu0 }
  0xcd   :  { %v1169_v17 = vmul.f32 -1.442695, %v260_v16  ;;  %v142_v4 = vadd.f32 %v141_v3, %v1437_v13 }
  0xcf   :  { %1292 = vpow2.f32 %v1169_v17 }
  0xd0   :  { %1294 = vtanh.f32 %v260_v16 }
  0xdc   :  { %v1293_v18 = vpop.eup %1292 }
  0xdd   :  { %v265_v19 = vadd.f32 1.0, %v1293_v18  ;;  %v1295_v21 = vpop.eup %1294 }
  0xdf   :  { %1296 = vrcp.f32 %v265_v19 }
  0xec   :  { %v1297_v22 = vpop.eup %1296 }
  0xed   :  { %v268_v23 = vsel %vm180_vm5, %v1295_v21, %v1297_v22 }
  0xee   :  { %275 = vrot.lane.b32.xlu0 %v268_v23, %s1358_s29 }
 0x160   :  { %v276_v25 = vpop.permute.xlu0 %275 }
 0x161   :  { %v278_v26 = vsel %vm269_vm6, %v272_v24, %v276_v25 }
 0x162   :  { %285 = vrot.lane.b32.xlu1 %v278_v26, %s1359_s30 }
 0x166   :  { %280 = vrot.lane.b32.xlu1 %v182_v27, %s1358_s29 }
 0x1d4   :  { %v286_v28 = vpop.permute.xlu1 %285 }
 0x1d5   :  { %v288_v29 = vmul.f32 %v286_v28, %v278_v26  ;;  %v173_v28 = vld [vmem:[%s1697_s1 + $0x18] sm:$0xff] }
 0x1d6   :  { %vm631_vm9 = vcmp.gt.f32.partialorder %v173_v28, 0.0 }
 0x1d7   :  { %290 = vrot.lane.b32.xlu0 %v288_v29, %s1360_s9  ;;  %v147_v29 = vadd.f32 %v1237_v1, %v1437_v13 }
 0x1d8   :  { %v281_v30 = vpop.permute.xlu1 %280 }
 0x1d9   :  { %v283_v31 = vmul.f32 %v281_v30, %v278_v26 }
 0x249   :  { %v291_v32 = vpop.permute.xlu0 %290 }
 0x24a   :  { %v1452_v33 = vadd.f32 %v291_v32, %v283_v31 }
 0x24c   :  { %1298 = vtanh.f32 %v1452_v33 }
 0x259   :  { %v1299_v34 = vpop.eup %1298 }
 0x25a   :  { %296 = vrot.lane.b32.xlu1 %v1299_v34, %s1361_s10 }
 0x25e   :  { %393 = vrot.lane.b32.xlu1 %v171_v38, %s1358_s29 }
 0x2cc   :  { %v297_v35 = vpop.permute.xlu1 %296 }
 0x2cd   :  { %v299_v36 = vmul.f32 %v297_v35, %v278_v26 }
 0x2cf   :  { %301 = vrot.lane.b32.xlu0 %v299_v36, %s1362_s4 }
 0x2d0   :  { %v394_v49 = vpop.permute.xlu1 %393 }
 0x341   :  { %v302_v37 = vpop.permute.xlu0 %301 }
 0x342   :  { %304 = vst.msk [vmem:[%s1699_s5] sm:$0xff] %vm183_vm3, %v302_v37  ;;  %1252 = vmatmul.mubr.msk.f32.vlgmr.msra.gmra.mxu1 %vm183_vm3, %v302_v37 }
 0x343   :  { %1255 = vmatpush3.msk.msra.mxu1 %vm187_vm1, %v1402_v0  ;;  %1256 = vmatprep.mubr.msk.f32.mxu1 %vm1357_vm4, %v1356_v2 }
 0x344   :  { %1259 = vmatprep.subr.mxu1 %v1356_v2 }
 0x402   :  { %v378_v40 = vpop.f32.mrf.mxu1 }
 0x403   :  { %v382_v41 = vadd.f32 %v378_v40, %v137_v39 }
 0x404   :  { %v1253_v42 = vpop.f32.mrf.mxu1 }
 0x405   :  { %v1172_v43 = vmul.f32 -1.442695, %v382_v41 }
 0x407   :  { %1300 = vpow2.f32 %v1172_v43 }
 0x408   :  { %1302 = vtanh.f32 %v382_v41 }
 0x414   :  { %v1301_v44 = vpop.eup %1300 }
 0x415   :  { %v387_v45 = vadd.f32 1.0, %v1301_v44  ;;  %v1303_v46 = vpop.eup %1302 }
 0x417   :  { %1304 = vrcp.f32 %v387_v45 }
 0x424   :  { %v1305_v47 = vpop.eup %1304 }
 0x425   :  { %v390_v48 = vsel %vm180_vm5, %v1303_v46, %v1305_v47 }
 0x426   :  { %397 = vrot.lane.b32.xlu0 %v390_v48, %s1358_s29  ;;  %v27_v48 = vld [vmem:[%s1695_s0 + $0x20] sm:$0xff] }
 0x427   :  { %1238 = vmatprep.mubr.msk.f32.mxu0 %vm37_vm0, %v27_v48  ;;  %v176_v48 = vld [vmem:[%s1697_s1 + $0x30] sm:$0xff] }
 0x428   :  { %vm991_vm12 = vcmp.gt.f32.partialorder %v176_v48, 0.0 }
 0x498   :  { %v398_v50 = vpop.permute.xlu0 %397 }
 0x499   :  { %v400_v51 = vsel %vm391_vm7, %v394_v49, %v398_v50  ;;  %v28_v49 = vld [vmem:[%s1695_s0 + $0x28] sm:$0xff]  ;;  %v29_v50 = vld [vmem:[%s1695_s0 + $0x30] sm:$0xff] }
 0x49a   :  { %403 = vrot.lane.b32.xlu1 %v400_v51, %s1359_s30  ;;  %v401_v54 = vmul.f32 %v400_v51, %v1452_v33  ;;  %1239 = vmatmul.mubr.msk.f32.gmra.mxu0 %vm37_vm0, %v28_v49 }
 0x49b   :  { %1241 = vmatprep.mubr.msk.f32.mxu0 %vm37_vm0, %v29_v50 }
 0x50c   :  { %v404_v52 = vpop.permute.xlu1 %403 }
 0x50d   :  { %v406_v53 = vmul.f32 %v404_v52, %v400_v51 }
 0x50f   :  { %408 = vrot.lane.b32.xlu0 %v406_v53, %s1360_s9 }
 0x55a   :  { %v1240_v58 = vpop.f32.mrf.mxu0 }
 0x581   :  { %v409_v55 = vpop.permute.xlu0 %408 }
 0x582   :  { %v1478_v56 = vadd.f32 %v409_v55, %v401_v54 }
 0x584   :  { %1306 = vtanh.f32 %v1478_v56 }
 0x591   :  { %v1307_v59 = vpop.eup %1306 }
 0x592   :  { %414 = vrot.lane.b32.xlu1 %v1307_v59, %s1361_s10  ;;  %v151_v59 = vpop.f32.mrf.mxu0 }
 0x596   :  { %513 = vrot.lane.b32.xlu1 %v172_v63, %s1358_s29 }
 0x604   :  { %v415_v60 = vpop.permute.xlu1 %414 }
 0x605   :  { %v417_v61 = vmul.f32 %v415_v60, %v400_v51  ;;  %v30_v51 = vld [vmem:[%s1695_s0 + $0x38] sm:$0xff] }
 0x606   :  { %1242 = vmatmul.mubr.msk.f32.gmra.mxu0 %vm37_vm0, %v30_v51 }
 0x607   :  { %419 = vrot.lane.b32.xlu0 %v417_v61, %s1362_s4  ;;  %1266 = vmatprep.mubr.msk.f32.mxu0 %vm1357_vm4, %v1356_v2 }
 0x608   :  { %v514_v15 = vpop.permute.xlu1 %513 }
 0x679   :  { %v420_v62 = vpop.permute.xlu0 %419 }
 0x67a   :  { %1173 = vst.msk [vmem:[%s1699_s5 + $0x8] sm:$0xff] %vm183_vm3, %v420_v62  ;;  %1257 = vmatmul.mubr.msk.f32.vlgmr.msra.gmra.mxu1 %vm183_vm3, %v420_v62  ;;  %v152_v62 = vadd.f32 %v151_v59, %v1437_v13 }
 0x67b   :  { %1260 = vmatpush3.msk.msra.mxu1 %vm187_vm1, %v1402_v0  ;;  %1261 = vmatprep.mubr.msk.f32.mxu1 %vm1357_vm4, %v1356_v2 }
 0x67c   :  { %1269 = vmatprep.subr.mxu1 %v1356_v2 }
 0x6c6   :  { %v1574_v60 = vpop.f32.mrf.mxu0 }
 0x6c8   :  { %v1576_v61 = vpop.f32.mrf.mxu0 }
 0x6c9   :  { %v162_v49 = vadd.f32 %v1576_v61, %v1437_v13 }
 0x73a   :  { %v498_v5 = vpop.f32.mrf.mxu1 }
 0x73b   :  { %v502_v6 = vadd.f32 %v498_v5, %v142_v4 }
 0x73c   :  { %v1258_v7 = vpop.f32.mrf.mxu1 }
 0x73d   :  { %v1177_v8 = vmul.f32 -1.442695, %v502_v6 }
 0x73f   :  { %1308 = vpow2.f32 %v1177_v8 }
 0x740   :  { %1310 = vtanh.f32 %v502_v6 }
 0x74c   :  { %v1309_v9 = vpop.eup %1308 }
 0x74d   :  { %v507_v10 = vadd.f32 1.0, %v1309_v9  ;;  %v1311_v11 = vpop.eup %1310 }
 0x74f   :  { %1312 = vrcp.f32 %v507_v10 }
 0x75c   :  { %v1313_v12 = vpop.eup %1312 }
 0x75d   :  { %v510_v14 = vsel %vm180_vm5, %v1311_v11, %v1313_v12 }
 0x75e   :  { %517 = vrot.lane.b32.xlu0 %v510_v14, %s1358_s29 }
 0x7d0   :  { %v518_v16 = vpop.permute.xlu0 %517 }
 0x7d1   :  { %v520_v17 = vsel %vm511_vm8, %v514_v15, %v518_v16 }
 0x7d2   :  { %523 = vrot.lane.b32.xlu1 %v520_v17, %s1359_s30  ;;  %v521_v21 = vmul.f32 %v520_v17, %v1478_v56 }
 0x844   :  { %v524_v18 = vpop.permute.xlu1 %523 }
 0x845   :  { %v526_v19 = vmul.f32 %v524_v18, %v520_v17 }
 0x847   :  { %528 = vrot.lane.b32.xlu0 %v526_v19, %s1360_s9 }
 0x8b9   :  { %v529_v22 = vpop.permute.xlu0 %528 }
 0x8ba   :  { %v1512_v23 = vadd.f32 %v529_v22, %v521_v21 }
 0x8bc   :  { %1314 = vtanh.f32 %v1512_v23 }
 0x8c9   :  { %v1315_v24 = vpop.eup %1314 }
 0x8ca   :  { %534 = vrot.lane.b32.xlu1 %v1315_v24, %s1361_s10 }
 0x8ce   :  { %633 = vrot.lane.b32.xlu1 %v173_v28, %s1358_s29 }
 0x93c   :  { %v535_v25 = vpop.permute.xlu1 %534 }
 0x93d   :  { %v537_v26 = vmul.f32 %v535_v25, %v520_v17  ;;  %v175_v25 = vld [vmem:[%s1697_s1 + $0x28] sm:$0xff] }
 0x93e   :  { %vm871_vm11 = vcmp.gt.f32.partialorder %v175_v25, 0.0 }
 0x93f   :  { %539 = vrot.lane.b32.xlu0 %v537_v26, %s1362_s4  ;;  %v157_v26 = vadd.f32 %v1240_v58, %v1437_v13 }
 0x940   :  { %v634_v40 = vpop.permute.xlu1 %633 }
 0x9b1   :  { %v540_v27 = vpop.permute.xlu0 %539 }
 0x9b2   :  { %1178 = vst.msk [vmem:[%s1699_s5 + $0x10] sm:$0xff] %vm183_vm3, %v540_v27  ;;  %1262 = vmatmul.mubr.msk.f32.vlgmr.msra.gmra.mxu1 %vm183_vm3, %v540_v27 }
 0x9b3   :  { %1270 = vmatpush3.msk.msra.mxu1 %vm187_vm1, %v1402_v0  ;;  %1271 = vmatprep.mubr.msk.f32.mxu1 %vm1357_vm4, %v1356_v2 }
 0x9b4   :  { %1279 = vmatprep.subr.mxu1 %v1356_v2 }
 0xa72   :  { %v618_v30 = vpop.f32.mrf.mxu1 }
 0xa73   :  { %v622_v31 = vadd.f32 %v618_v30, %v147_v29 }
 0xa74   :  { %v1263_v32 = vpop.f32.mrf.mxu1 }
 0xa75   :  { %v1182_v34 = vmul.f32 -1.442695, %v622_v31 }
 0xa77   :  { %1316 = vpow2.f32 %v1182_v34 }
 0xa78   :  { %1318 = vtanh.f32 %v622_v31 }
 0xa84   :  { %v1317_v35 = vpop.eup %1316 }
 0xa85   :  { %v627_v36 = vadd.f32 1.0, %v1317_v35  ;;  %v1319_v37 = vpop.eup %1318 }
 0xa87   :  { %1320 = vrcp.f32 %v627_v36 }
 0xa94   :  { %v1321_v38 = vpop.eup %1320 }
 0xa95   :  { %v630_v39 = vsel %vm180_vm5, %v1319_v37, %v1321_v38 }
 0xa96   :  { %637 = vrot.lane.b32.xlu0 %v630_v39, %s1358_s29 }
 0xb08   :  { %v638_v41 = vpop.permute.xlu0 %637 }
 0xb09   :  { %v640_v42 = vsel %vm631_vm9, %v634_v40, %v638_v41 }
 0xb0a   :  { %643 = vrot.lane.b32.xlu1 %v640_v42, %s1359_s30  ;;  %v641_v45 = vmul.f32 %v640_v42, %v1512_v23 }
 0xb7c   :  { %v644_v43 = vpop.permute.xlu1 %643 }
 0xb7d   :  { %v646_v44 = vmul.f32 %v644_v43, %v640_v42 }
 0xb7f   :  { %648 = vrot.lane.b32.xlu0 %v646_v44, %s1360_s9 }
 0xbf1   :  { %v649_v46 = vpop.permute.xlu0 %648 }
 0xbf2   :  { %v1538_v47 = vadd.f32 %v649_v46, %v641_v45 }
 0xbf4   :  { %1322 = vtanh.f32 %v1538_v47 }
 0xc01   :  { %v1323_v52 = vpop.eup %1322 }
 0xc02   :  { %654 = vrot.lane.b32.xlu1 %v1323_v52, %s1361_s10 }
 0xc06   :  { %753 = vrot.lane.b32.xlu1 %v174_v57, %s1358_s29 }
 0xc74   :  { %v655_v53 = vpop.permute.xlu1 %654 }
 0xc75   :  { %v657_v54 = vmul.f32 %v655_v53, %v640_v42 }
 0xc77   :  { %659 = vrot.lane.b32.xlu0 %v657_v54, %s1362_s4 }
 0xc78   :  { %v754_v10 = vpop.permute.xlu1 %753 }
 0xce9   :  { %v660_v55 = vpop.permute.xlu0 %659 }
 0xcea   :  { %1183 = vst.msk [vmem:[%s1699_s5 + $0x18] sm:$0xff] %vm183_vm3, %v660_v55  ;;  %1267 = vmatmul.mubr.msk.f32.vlgmr.msra.gmra.mxu0 %vm183_vm3, %v660_v55 }
 0xceb   :  { %1275 = vmatpush3.msk.msra.mxu0 %vm187_vm1, %v1402_v0  ;;  %1276 = vmatprep.mubr.msk.f32.mxu0 %vm1357_vm4, %v1356_v2 }
 0xdaa   :  { %v738_v63 = vpop.f32.mrf.mxu0 }
 0xdab   :  { %v742_v1 = vadd.f32 %v738_v63, %v152_v62 }
 0xdac   :  { %v1268_v3 = vpop.f32.mrf.mxu0 }
 0xdad   :  { %v1187_v4 = vmul.f32 -1.442695, %v742_v1 }
 0xdaf   :  { %1324 = vpow2.f32 %v1187_v4 }
 0xdb0   :  { %1326 = vtanh.f32 %v742_v1 }
 0xdbc   :  { %v1325_v5 = vpop.eup %1324 }
 0xdbd   :  { %v747_v6 = vadd.f32 1.0, %v1325_v5  ;;  %v1327_v7 = vpop.eup %1326 }
 0xdbf   :  { %1328 = vrcp.f32 %v747_v6 }
 0xdcc   :  { %v1329_v8 = vpop.eup %1328 }
 0xdcd   :  { %v750_v9 = vsel %vm180_vm5, %v1327_v7, %v1329_v8 }
 0xdce   :  { %757 = vrot.lane.b32.xlu0 %v750_v9, %s1358_s29 }
 0xe40   :  { %v758_v11 = vpop.permute.xlu0 %757 }
 0xe41   :  { %v760_v12 = vsel %vm751_vm10, %v754_v10, %v758_v11  ;;  %v177_v11 = vld [vmem:[%s1697_s1 + $0x38] sm:$0xff]  ;;  %s1363_s1 = smov 120  }
 0xe42   :  { %763 = vrot.lane.b32.xlu1 %v760_v12, %s1359_s30  ;;  %v761_v16 = vmul.f32 %v760_v12, %v1538_v47  ;;  %vm1111_vm13 = vcmp.gt.f32.partialorder %v177_v11, 0.0 }
 0xeb4   :  { %v764_v14 = vpop.permute.xlu1 %763 }
 0xeb5   :  { %v766_v15 = vmul.f32 %v764_v14, %v760_v12 }
 0xeb7   :  { %768 = vrot.lane.b32.xlu0 %v766_v15, %s1360_s9 }
 0xf29   :  { %v769_v17 = vpop.permute.xlu0 %768 }
 0xf2a   :  { %v1585_v18 = vadd.f32 %v769_v17, %v761_v16 }
 0xf2c   :  { %1330 = vtanh.f32 %v1585_v18 }
 0xf39   :  { %v1331_v19 = vpop.eup %1330 }
 0xf3a   :  { %774 = vrot.lane.b32.xlu1 %v1331_v19, %s1361_s10 }
 0xf3e   :  { %873 = vrot.lane.b32.xlu1 %v175_v25, %s1358_s29 }
 0xfac   :  { %v775_v21 = vpop.permute.xlu1 %774 }
 0xfad   :  { %v777_v22 = vmul.f32 %v775_v21, %v760_v12  ;;  %v167_v12 = vadd.f32 %v1574_v60, %v1437_v13 }
 0xfaf   :  { %779 = vrot.lane.b32.xlu0 %v777_v22, %s1362_s4 }
 0xfb0   :  { %v874_v35 = vpop.permute.xlu1 %873 }
0x1021   :  { %v780_v24 = vpop.permute.xlu0 %779 }
0x1022   :  { %1188 = vst.msk [vmem:[%s1699_s5 + $0x20] sm:$0xff] %vm183_vm3, %v780_v24  ;;  %1272 = vmatmul.mubr.msk.f32.vlgmr.msra.gmra.mxu1 %vm183_vm3, %v780_v24 }
0x1023   :  { %1280 = vmatpush3.msk.msra.mxu1 %vm187_vm1, %v1402_v0  ;;  %1281 = vmatprep.mubr.msk.f32.mxu1 %vm1357_vm4, %v1356_v2 }
0x10e2   :  { %v858_v27 = vpop.f32.mrf.mxu1 }
0x10e3   :  { %v862_v28 = vadd.f32 %v858_v27, %v157_v26 }
0x10e4   :  { %v1273_v29 = vpop.f32.mrf.mxu1 }
0x10e5   :  { %v1192_v30 = vmul.f32 -1.442695, %v862_v28 }
0x10e7   :  { %1332 = vpow2.f32 %v1192_v30 }
0x10e8   :  { %1334 = vtanh.f32 %v862_v28 }
0x10f4   :  { %v1333_v31 = vpop.eup %1332 }
0x10f5   :  { %v867_v32 = vadd.f32 1.0, %v1333_v31  ;;  %v1335_v0 = vpop.eup %1334 }
0x10f7   :  { %1336 = vrcp.f32 %v867_v32 }
0x1104   :  { %v1337_v34 = vpop.eup %1336 }
0x1105   :  { %v870_v2 = vsel %vm180_vm5, %v1335_v0, %v1337_v34 }
0x1106   :  { %877 = vrot.lane.b32.xlu0 %v870_v2, %s1358_s29 }
0x1178   :  { %v878_v36 = vpop.permute.xlu0 %877 }
0x1179   :  { %v880_v37 = vsel %vm871_vm11, %v874_v35, %v878_v36 }
0x117a   :  { %883 = vrot.lane.b32.xlu1 %v880_v37, %s1359_s30  ;;  %v881_v40 = vmul.f32 %v880_v37, %v1585_v18 }
0x11ec   :  { %v884_v38 = vpop.permute.xlu1 %883 }
0x11ed   :  { %v886_v39 = vmul.f32 %v884_v38, %v880_v37 }
0x11ef   :  { %888 = vrot.lane.b32.xlu0 %v886_v39, %s1360_s9 }
0x1261   :  { %v889_v41 = vpop.permute.xlu0 %888 }
0x1262   :  { %v1610_v42 = vadd.f32 %v889_v41, %v881_v40 }
0x1264   :  { %1338 = vtanh.f32 %v1610_v42 }
0x1271   :  { %v1339_v43 = vpop.eup %1338 }
0x1272   :  { %894 = vrot.lane.b32.xlu1 %v1339_v43, %s1361_s10 }
0x1276   :  { %993 = vrot.lane.b32.xlu1 %v176_v48, %s1358_s29 }
0x12e4   :  { %v895_v44 = vpop.permute.xlu1 %894 }
0x12e5   :  { %v897_v45 = vmul.f32 %v895_v44, %v880_v37 }
0x12e7   :  { %899 = vrot.lane.b32.xlu0 %v897_v45, %s1362_s4 }
0x12e8   :  { %v994_v62 = vpop.permute.xlu1 %993 }
0x1359   :  { %v900_v46 = vpop.permute.xlu0 %899 }
0x135a   :  { %1193 = vst.msk [vmem:[%s1699_s5 + $0x28] sm:$0xff] %vm183_vm3, %v900_v46  ;;  %1277 = vmatmul.mubr.msk.f32.vlgmr.msra.gmra.mxu0 %vm183_vm3, %v900_v46 }
0x141a   :  { %v978_v50 = vpop.f32.mrf.mxu0 }
0x141b   :  { %v982_v51 = vadd.f32 %v978_v50, %v162_v49 }
0x141c   :  { %v1278_v52 = vpop.f32.mrf.mxu0 }
0x141d   :  { %v1197_v53 = vmul.f32 -1.442695, %v982_v51 }
0x141f   :  { %1340 = vpow2.f32 %v1197_v53 }
0x1420   :  { %1342 = vtanh.f32 %v982_v51 }
0x142c   :  { %v1341_v54 = vpop.eup %1340 }
0x142d   :  { %v987_v55 = vadd.f32 1.0, %v1341_v54  ;;  %v1343_v57 = vpop.eup %1342 }
0x142f   :  { %1344 = vrcp.f32 %v987_v55 }
0x143c   :  { %v1345_v58 = vpop.eup %1344 }
0x143d   :  { %v990_v59 = vsel %vm180_vm5, %v1343_v57, %v1345_v58 }
0x143e   :  { %997 = vrot.lane.b32.xlu0 %v990_v59, %s1358_s29 }
0x14b0   :  { %v998_v63 = vpop.permute.xlu0 %997 }
0x14b1   :  { %v1000_v61 = vsel %vm991_vm12, %v994_v62, %v998_v63 }
0x14b2   :  { %1003 = vrot.lane.b32.xlu1 %v1000_v61, %s1359_s30  ;;  %v1001_v4 = vmul.f32 %v1000_v61, %v1610_v42 }
0x1524   :  { %v1004_v1 = vpop.permute.xlu1 %1003 }
0x1525   :  { %v1006_v3 = vmul.f32 %v1004_v1, %v1000_v61 }
0x1527   :  { %1008 = vrot.lane.b32.xlu0 %v1006_v3, %s1360_s9 }
0x1599   :  { %v1009_v5 = vpop.permute.xlu0 %1008 }
0x159a   :  { %v1011_v6 = vadd.f32 %v1009_v5, %v1001_v4 }
0x159c   :  { %1346 = vtanh.f32 %v1011_v6 }
0x15a9   :  { %v1347_v7 = vpop.eup %1346 }
0x15aa   :  { %1014 = vrot.lane.b32.xlu1 %v1347_v7, %s1361_s10 }
0x15ae   :  { %1113 = vrot.lane.b32.xlu1 %v177_v11, %s1358_s29 }
0x161c   :  { %v1015_v8 = vpop.permute.xlu1 %1014 }
0x161d   :  { %v1017_v9 = vmul.f32 %v1015_v8, %v1000_v61 }
0x161f   :  { %1019 = vrot.lane.b32.xlu0 %v1017_v9, %s1362_s4 }
0x1620   :  { %v1114_v26 = vpop.permute.xlu1 %1113 }
0x1691   :  { %v1020_v10 = vpop.permute.xlu0 %1019 }
0x1692   :  { %1198 = vst.msk [vmem:[%s1699_s5 + $0x30] sm:$0xff] %vm183_vm3, %v1020_v10  ;;  %1282 = vmatmul.mubr.msk.f32.vlgmr.msra.gmra.mxu1 %vm183_vm3, %v1020_v10 }
0x1752   :  { %v1098_v14 = vpop.f32.mrf.mxu1 }
0x1753   :  { %v1102_v15 = vadd.f32 %v1098_v14, %v167_v12 }
0x1754   :  { %v1283_v16 = vpop.f32.mrf.mxu1 }
0x1755   :  { %v1202_v17 = vmul.f32 -1.442695, %v1102_v15 }
0x1757   :  { %1348 = vpow2.f32 %v1202_v17 }
0x1758   :  { %1350 = vtanh.f32 %v1102_v15 }
0x1764   :  { %v1349_v19 = vpop.eup %1348 }
0x1765   :  { %v1107_v21 = vadd.f32 1.0, %v1349_v19  ;;  %v1351_v22 = vpop.eup %1350 }
0x1767   :  { %1352 = vrcp.f32 %v1107_v21 }
0x1774   :  { %v1353_v24 = vpop.eup %1352 }
0x1775   :  { %v1110_v25 = vsel %vm180_vm5, %v1351_v22, %v1353_v24 }
0x1776   :  { %1117 = vrot.lane.b32.xlu0 %v1110_v25, %s1358_s29 }
0x17e8   :  { %v1118_v27 = vpop.permute.xlu0 %1117 }
0x17e9   :  { %v1120_v13 = vsel %vm1111_vm13, %v1114_v26, %v1118_v27 }
0x17ea   :  { %1123 = vrot.lane.b32.xlu1 %v1120_v13, %s1359_s30  ;;  %v1121_v20 = vmul.f32 %v1120_v13, %v1011_v6 }
0x185c   :  { %v1124_v60 = vpop.permute.xlu1 %1123 }
0x185d   :  { %v1126_v28 = vmul.f32 %v1124_v60, %v1120_v13 }
0x185f   :  { %1128 = vrot.lane.b32.xlu0 %v1126_v28, %s1360_s9 }
0x1863   :  { %306 = vrot.lane.b32.xlu0 %v1452_v33, %s1363_s1 }
0x1867   :  { %545 = vrot.lane.b32.xlu0 %v1512_v23, %s1363_s1 }
0x186b   :  { %785 = vrot.lane.b32.xlu0 %v1585_v18, %s1363_s1 }
0x186f   :  { %1025 = vrot.lane.b32.xlu0 %v1011_v6, %s1363_s1 }
0x18d1   :  { %v1129_v29 = vpop.permute.xlu0 %1128 }
0x18d2   :  { %v1131_v30 = vadd.f32 %v1129_v29, %v1121_v20 }
0x18d4   :  { %1354 = vtanh.f32 %v1131_v30  ;;  %1145 = vrot.lane.b32.xlu0 %v1131_v30, %s1363_s1 }
0x18d5   :  { %v307_v31 = vpop.permute.xlu0 %306 }
0x18d6   :  { %309 = vst.msk [vmem:[%s1700_s6] sm:$0xff] %vm183_vm3, %v307_v31 }
0x18d9   :  { %v546_v32 = vpop.permute.xlu0 %545 }
0x18da   :  { %1179 = vst.msk [vmem:[%s1700_s6 + $0x10] sm:$0xff] %vm183_vm3, %v546_v32 }
0x18dd   :  { %v786_v33 = vpop.permute.xlu0 %785 }
0x18de   :  { %1189 = vst.msk [vmem:[%s1700_s6 + $0x20] sm:$0xff] %vm183_vm3, %v786_v33 }
0x18e1   :  { %v1355_v23 = vpop.eup %1354  ;;  %v1026_v18 = vpop.permute.xlu0 %1025 }
0x18e2   :  { %1199 = vst.msk [vmem:[%s1700_s6 + $0x30] sm:$0xff] %vm183_vm3, %v1026_v18  ;;  %1134 = vrot.lane.b32.xlu1 %v1355_v23, %s1361_s10 }
0x18e6   :  { %425 = vrot.lane.b32.xlu1 %v1478_v56, %s1363_s1 }
0x18ea   :  { %665 = vrot.lane.b32.xlu1 %v1538_v47, %s1363_s1 }
0x18ee   :  { %905 = vrot.lane.b32.xlu1 %v1610_v42, %s1363_s1 }
0x1946   :  { %v1146_v0 = vpop.permute.xlu0 %1145 }
0x1947   :  { %1204 = vst.msk [vmem:[%s1700_s6 + $0x38] sm:$0xff] %vm183_vm3, %v1146_v0 }
0x1954   :  { %v1135_v34 = vpop.permute.xlu1 %1134 }
0x1955   :  { %v1137_v2 = vmul.f32 %v1135_v34, %v1120_v13 }
0x1957   :  { %1139 = vrot.lane.b32.xlu1 %v1137_v2, %s1362_s4 }
0x1958   :  { %v426_v35 = vpop.permute.xlu1 %425 }
0x1959   :  { %1174 = vst.msk [vmem:[%s1700_s6 + $0x8] sm:$0xff] %vm183_vm3, %v426_v35 }
0x195c   :  { %v666_v56 = vpop.permute.xlu1 %665 }
0x195d   :  { %1184 = vst.msk [vmem:[%s1700_s6 + $0x18] sm:$0xff] %vm183_vm3, %v666_v56 }
0x1960   :  { %v906_v47 = vpop.permute.xlu1 %905 }
0x1961   :  { %1194 = vst.msk [vmem:[%s1700_s6 + $0x28] sm:$0xff] %vm183_vm3, %v906_v47 }
0x19c9   :  { %v1140_v36 = vpop.permute.xlu1 %1139 }
0x19ca   :  { %1203 = vst.msk [vmem:[%s1699_s5 + $0x38] sm:$0xff] %vm183_vm3, %v1140_v36 }

</bundles_post_ra>
